<compile_context>
chip_gen: v7x
topology: tpu7x:2x2x1
jax: 0.10.0
libtpu: 0.0.40
codegen_flags: <defaults>
</compile_context>

<pallas_src>
import math

import jax
import jax.numpy as jnp
from jax.experimental import pallas as pl
from jax.experimental.pallas import tpu as pltpu

_LANE = 128
_SUBLANE = 8


def _round_up(n, m):
    return ((n + m - 1) // m) * m


def _make_mlp_kernel(num_layers: int):
    """Fused MLP kernel over one batch tile.
    refs = (x_ref, w0, b0, w1, b1, ..., out_ref)."""

    def kernel(x_ref, *refs):
        out_ref = refs[-1]
        wb = refs[:-1]
        h = x_ref[...].astype(jnp.float32)
        for l in range(num_layers):
            w = wb[2 * l][...]
            b = wb[2 * l + 1][...]          # (1, out) -> broadcasts over rows
            h = jnp.dot(h, w, preferred_element_type=jnp.float32) + b
            if l < num_layers - 1:
                h = jnp.maximum(h, 0.0)     # ReLU (Dropout is identity at eval)
            else:
                h = jax.nn.sigmoid(h)       # Sigmoid output activation
        out_ref[...] = h.astype(out_ref.dtype)

    return kernel


def discriminator_forward(x, params, *, tm=None):
    """x: (B, *input_shape) f32. params: list of (W (in,out), b (1,out)),
    last layer has out=1. Returns (B, 1) sigmoid scores."""
    B = x.shape[0]
    x_flat = x.reshape(B, -1).astype(jnp.float32)
    in_len = x_flat.shape[1]
    num_layers = len(params)

    # --- pad input feature dim to a lane multiple (zero cols in x, zero rows
    #     in W0) -> lane-dense x DMA and full-lane first matmul.
    in_pad = _round_up(in_len, _LANE)
    if in_pad != in_len:
        x_flat = jnp.pad(x_flat, ((0, 0), (0, in_pad - in_len)))
        w0, b0 = params[0]
        w0 = jnp.pad(w0.astype(jnp.float32), ((0, in_pad - in_len), (0, 0)))
        params = [(w0, b0)] + list(params[1:])

    # --- pad the final (hidden, 1) layer out to 128 lanes (lane-dense store,
    #     full-lane final matmul); extra columns are zeros -> sliced off below.
    w_last, b_last = params[-1]
    out_pad = _LANE
    w_last_p = jnp.zeros((w_last.shape[0], out_pad), jnp.float32).at[:, :1].set(
        w_last.astype(jnp.float32))
    b_last_p = jnp.zeros((1, out_pad), jnp.float32).at[:, :1].set(
        b_last.astype(jnp.float32))
    padded_params = list(params[:-1]) + [(w_last_p, b_last_p)]

    # --- batch tiling: big tiles, ragged batch padded up to the tile.
    if tm is None:
        tm = min(512, _round_up(B, _SUBLANE))   # VMEM-safe even on v7x (64 MiB)
    tm = _round_up(tm, _SUBLANE)
    B_pad = _round_up(B, tm)
    if B_pad != B:
        x_flat = jnp.pad(x_flat, ((0, B_pad - B), (0, 0)))

    in_specs = [pl.BlockSpec((tm, in_pad), lambda i: (i, 0))]
    flat_params = []
    for (w, b) in padded_params:
        # Weights / biases are small: whole tensor, constant block index
        # (fetched once, resident across grid steps).
        in_specs.append(pl.BlockSpec(w.shape, lambda i: (0, 0)))
        in_specs.append(pl.BlockSpec(b.shape, lambda i: (0, 0)))
        flat_params.extend([w.astype(jnp.float32), b.astype(jnp.float32)])

    flops = 2 * B_pad * sum(w.shape[0] * w.shape[1] for (w, _) in padded_params)
    bytes_accessed = (B_pad * (in_pad + out_pad) * 4
                      + sum((w.size + b.size) * 4 for (w, b) in padded_params))
    transcendentals = B_pad * out_pad       # sigmoid on the final layer

    out = pl.pallas_call(
        _make_mlp_kernel(num_layers),
        out_shape=jax.ShapeDtypeStruct((B_pad, out_pad), jnp.float32),
        grid=(B_pad // tm,),
        in_specs=in_specs,
        out_specs=pl.BlockSpec((tm, out_pad), lambda i: (i, 0)),
        compiler_params=pltpu.CompilerParams(
            dimension_semantics=("parallel",)),
        cost_estimate=pl.CostEstimate(
            flops=flops,
            transcendentals=transcendentals,
            bytes_accessed=bytes_accessed),
    )(x_flat, *flat_params)

    # Drop batch padding and lane padding -> (B, 1), matching .view(-1, 1).
    return out[:B, :1]


def init_discriminator_params(key, input_shape, layer_sizes):
    """Deterministic synthetic init matching nn.Linear shapes (stored
    transposed as (in, out)); final layer maps to a single logit."""
    input_length = math.prod(input_shape)
    dims = [input_length] + list(layer_sizes) + [1]
    params = []
    for din, dout in zip(dims[:-1], dims[1:]):
        key, kw, kb = jax.random.split(key, 3)
        bound = 1.0 / math.sqrt(float(din))
        w = jax.random.uniform(kw, (din, dout), jnp.float32, -bound, bound)
        b = jax.random.uniform(kb, (1, dout), jnp.float32, -bound, bound)
        params.append((w, b))
    return params


def discriminator_reference(x, params):
    """Pure-JAX reference (same semantics) for a sanity check."""
    h = x.reshape(x.shape[0], -1)
    n = len(params)
    for l, (w, b) in enumerate(params):
        h = h @ w + b
        h = jnp.maximum(h, 0.0) if l < n - 1 else jax.nn.sigmoid(h)
    return h.reshape(-1, 1)


if __name__ == "__main__":
    key = jax.random.PRNGKey(0)

    # Config 1: Discriminator(input_shape=(1, 16, 16), layer_sizes=[128, 64]).
    input_shape = (1, 16, 16)      # input_length = 256
    layer_sizes = [128, 64]
    batch = 10                     # not a multiple of 8 -> exercises padding path

    key, kx, kp = jax.random.split(key, 3)
    x = jax.random.normal(kx, (batch,) + input_shape, jnp.float32)
    params = init_discriminator_params(kp, input_shape, layer_sizes)

    y = jax.block_until_ready(discriminator_forward(x, params))
    assert y.shape == (batch, 1), y.shape
    y_ref = discriminator_reference(x, params)
    assert jnp.allclose(y, y_ref, atol=1e-5, rtol=1e-5), "mismatch vs reference (cfg1)"

    # Config 2: no hidden layers (layer_sizes=[]) and a non-128-multiple,
    # non-8-multiple input length -> exercises the feature-padding path.
    input_shape2 = (3, 7, 5)       # input_length = 105
    key, kx2, kp2 = jax.random.split(key, 3)
    x2 = jax.random.normal(kx2, (4,) + input_shape2, jnp.float32)
    params2 = init_discriminator_params(kp2, input_shape2, [])

    y2 = jax.block_until_ready(discriminator_forward(x2, params2))
    assert y2.shape == (4, 1), y2.shape
    y2_ref = discriminator_reference(x2, params2)
    assert jnp.allclose(y2, y2_ref, atol=1e-5, rtol=1e-5), "mismatch vs reference (cfg2)"

    print("KERNEL_OK")
</pallas_src>

<mosaic_0001>
module attributes {stable_mosaic.version = 11 : i64} {
  func.func @kernel(%arg0: i32, %arg1: memref<16x256xf32, #tpu.memory_space<vmem>>, %arg2: memref<256x128xf32, #tpu.memory_space<vmem>>, %arg3: memref<1x128xf32, #tpu.memory_space<vmem>>, %arg4: memref<128x64xf32, #tpu.memory_space<vmem>>, %arg5: memref<1x64xf32, #tpu.memory_space<vmem>>, %arg6: memref<64x128xf32, #tpu.memory_space<vmem>>, %arg7: memref<1x128xf32, #tpu.memory_space<vmem>>, %arg8: memref<16x128xf32, #tpu.memory_space<vmem>>) attributes {dimension_semantics = [#tpu.dimension_semantics<parallel>], iteration_bounds = array<i64: 1>, scalar_prefetch = 0 : i64, scratch_operands = 0 : i64, tpu.core_type = #tpu.core_type<tc>, window_params = [{transform_indices = @transform_0, window_bounds = array<i64: 16, 256>}, {pipeline_mode = #tpu.pipeline_mode<synchronous>, transform_indices = @transform_1, window_bounds = array<i64: 256, 128>}, {pipeline_mode = #tpu.pipeline_mode<synchronous>, transform_indices = @transform_2, window_bounds = array<i64: 1, 128>}, {pipeline_mode = #tpu.pipeline_mode<synchronous>, transform_indices = @transform_3, window_bounds = array<i64: 128, 64>}, {pipeline_mode = #tpu.pipeline_mode<synchronous>, transform_indices = @transform_4, window_bounds = array<i64: 1, 64>}, {pipeline_mode = #tpu.pipeline_mode<synchronous>, transform_indices = @transform_5, window_bounds = array<i64: 64, 128>}, {pipeline_mode = #tpu.pipeline_mode<synchronous>, transform_indices = @transform_6, window_bounds = array<i64: 1, 128>}, {transform_indices = @transform_7, window_bounds = array<i64: 16, 128>}]} {
    %c0 = arith.constant 0 : index
    %c0_0 = arith.constant 0 : index
    %0 = vector.load %arg1[%c0, %c0_0] : memref<16x256xf32, #tpu.memory_space<vmem>>, vector<16x256xf32>
    %c0_1 = arith.constant 0 : index
    %c0_2 = arith.constant 0 : index
    %1 = vector.load %arg2[%c0_1, %c0_2] : memref<256x128xf32, #tpu.memory_space<vmem>>, vector<256x128xf32>
    %c0_3 = arith.constant 0 : index
    %c0_4 = arith.constant 0 : index
    %2 = vector.load %arg3[%c0_3, %c0_4] : memref<1x128xf32, #tpu.memory_space<vmem>>, vector<1x128xf32>
    %cst = arith.constant dense<0.000000e+00> : vector<16x128xf32>
    %3 = tpu.matmul %0, %1, %cst {dimension_numbers = #tpu.dot_dimension_numbers<[1], [0], [0], [1], [0, 0, 1, 1], [], []>} : vector<16x256xf32>, vector<256x128xf32>, vector<16x128xf32> -> vector<16x128xf32>
    %4 = vector.broadcast %2 : vector<1x128xf32> to vector<16x128xf32>
    %5 = arith.addf %3, %4 : vector<16x128xf32>
    %cst_5 = arith.constant 0.000000e+00 : f32
    %6 = vector.broadcast %cst_5 : f32 to vector<16x128xf32>
    %7 = arith.maximumf %5, %6 : vector<16x128xf32>
    %c0_6 = arith.constant 0 : index
    %c0_7 = arith.constant 0 : index
    %8 = vector.load %arg4[%c0_6, %c0_7] : memref<128x64xf32, #tpu.memory_space<vmem>>, vector<128x64xf32>
    %c0_8 = arith.constant 0 : index
    %c0_9 = arith.constant 0 : index
    %9 = vector.load %arg5[%c0_8, %c0_9] : memref<1x64xf32, #tpu.memory_space<vmem>>, vector<1x64xf32>
    %cst_10 = arith.constant dense<0.000000e+00> : vector<16x64xf32>
    %10 = tpu.matmul %7, %8, %cst_10 {dimension_numbers = #tpu.dot_dimension_numbers<[1], [0], [0], [1], [0, 0, 1, 1], [], []>} : vector<16x128xf32>, vector<128x64xf32>, vector<16x64xf32> -> vector<16x64xf32>
    %11 = vector.broadcast %9 : vector<1x64xf32> to vector<16x64xf32>
    %12 = arith.addf %10, %11 : vector<16x64xf32>
    %cst_11 = arith.constant 0.000000e+00 : f32
    %13 = vector.broadcast %cst_11 : f32 to vector<16x64xf32>
    %14 = arith.maximumf %12, %13 : vector<16x64xf32>
    %c0_12 = arith.constant 0 : index
    %c0_13 = arith.constant 0 : index
    %15 = vector.load %arg6[%c0_12, %c0_13] : memref<64x128xf32, #tpu.memory_space<vmem>>, vector<64x128xf32>
    %c0_14 = arith.constant 0 : index
    %c0_15 = arith.constant 0 : index
    %16 = vector.load %arg7[%c0_14, %c0_15] : memref<1x128xf32, #tpu.memory_space<vmem>>, vector<1x128xf32>
    %cst_16 = arith.constant dense<0.000000e+00> : vector<16x128xf32>
    %17 = tpu.matmul %14, %15, %cst_16 {dimension_numbers = #tpu.dot_dimension_numbers<[1], [0], [0], [1], [0, 0, 1, 1], [], []>} : vector<16x64xf32>, vector<64x128xf32>, vector<16x128xf32> -> vector<16x128xf32>
    %18 = vector.broadcast %16 : vector<1x128xf32> to vector<16x128xf32>
    %19 = arith.addf %17, %18 : vector<16x128xf32>
    %20 = arith.negf %19 : vector<16x128xf32>
    %21 = math.exp %20 : vector<16x128xf32>
    %cst_17 = arith.constant 1.000000e+00 : f32
    %22 = vector.broadcast %cst_17 : f32 to vector<16x128xf32>
    %23 = arith.addf %22, %21 : vector<16x128xf32>
    %24 = arith.divf %22, %23 : vector<16x128xf32>
    %c0_18 = arith.constant 0 : index
    %c0_19 = arith.constant 0 : index
    %25 = vector.load %arg8[%c0_18, %c0_19] : memref<16x128xf32, #tpu.memory_space<vmem>>, vector<16x128xf32>
    tpu.vector_store %arg8[%c0_18, %c0_19], %24 {strides = array<i32>} : memref<16x128xf32, #tpu.memory_space<vmem>>, vector<16x128xf32>,
    return
  }
  func.func @transform_0(%arg0: i32) -> (i32, i32) {
    %c0_i32 = arith.constant 0 : i32
    %c0_i32_0 = arith.constant 0 : i32
    return %arg0, %c0_i32 : i32, i32
  }
  func.func @transform_1(%arg0: i32) -> (i32, i32) {
    %c0_i32 = arith.constant 0 : i32
    %c0_i32_0 = arith.constant 0 : i32
    %c0_i32_1 = arith.constant 0 : i32
    return %c0_i32, %c0_i32_0 : i32, i32
  }
  func.func @transform_2(%arg0: i32) -> (i32, i32) {
    %c0_i32 = arith.constant 0 : i32
    %c0_i32_0 = arith.constant 0 : i32
    %c0_i32_1 = arith.constant 0 : i32
    return %c0_i32, %c0_i32_0 : i32, i32
  }
  func.func @transform_3(%arg0: i32) -> (i32, i32) {
    %c0_i32 = arith.constant 0 : i32
    %c0_i32_0 = arith.constant 0 : i32
    %c0_i32_1 = arith.constant 0 : i32
    return %c0_i32, %c0_i32_0 : i32, i32
  }
  func.func @transform_4(%arg0: i32) -> (i32, i32) {
    %c0_i32 = arith.constant 0 : i32
    %c0_i32_0 = arith.constant 0 : i32
    %c0_i32_1 = arith.constant 0 : i32
    return %c0_i32, %c0_i32_0 : i32, i32
  }
  func.func @transform_5(%arg0: i32) -> (i32, i32) {
    %c0_i32 = arith.constant 0 : i32
    %c0_i32_0 = arith.constant 0 : i32
    %c0_i32_1 = arith.constant 0 : i32
    return %c0_i32, %c0_i32_0 : i32, i32
  }
  func.func @transform_6(%arg0: i32) -> (i32, i32) {
    %c0_i32 = arith.constant 0 : i32
    %c0_i32_0 = arith.constant 0 : i32
    %c0_i32_1 = arith.constant 0 : i32
    return %c0_i32, %c0_i32_0 : i32, i32
  }
  func.func @transform_7(%arg0: i32) -> (i32, i32) {
    %c0_i32 = arith.constant 0 : i32
    %c0_i32_0 = arith.constant 0 : i32
    return %arg0, %c0_i32 : i32, i32
  }
}

</mosaic_0001>

<bundles_post_ra>
// kernel: tpu_custom_call.1
= control target key start
LH: loop header
LB: loop body
LE: loop exit
PB: predicated region body
PF: predicated region fallthrough
CT: control target
= control target key end

     0   :  { %12 = vsyncpa [#allocation3], 0  ;;  %s823_s0 = inlined_call_operand.vmem [shape: f32[16,256], index: 0, kind: input, shape index: {}]   ;;  %s824_s1 = inlined_call_operand.hbm [shape: f32[256,128], index: 1, kind: input, shape index: {}]   ;;  %s825_s2 = inlined_call_operand.vmem [shape: f32[1,128], index: 2, kind: input, shape index: {}]   ;;  %s826_s3 = inlined_call_operand.vmem [shape: f32[128,64], index: 3, kind: input, shape index: {}]   ;;  %s827_s4 = inlined_call_operand.vmem [shape: f32[1,64], index: 4, kind: input, shape index: {}]   ;;  %s828_s5 = inlined_call_operand.vmem [shape: f32[64,128], index: 5, kind: input, shape index: {}]   ;;  %s829_s6 = inlined_call_operand.vmem [shape: f32[1,128], index: 6, kind: input, shape index: {}]   ;;  %s830_s7 = inlined_call_operand.hbm [shape: f32[16,128], index: 7, kind: output, shape index: {}]  }
   0x1   :  { %13 = vsyncpa [#allocation4], 0  ;;  %s656_s24 = smov [#allocation2]   ;;  %s608_s28 = scalar_lea.hbm %s824_s1, 4096 }
   0x2   :  { %s21_s25 = sshll.u32 %s656_s24, 4  ;;  %p609_p0 = scmp.ne.s32.totalorder %s824_s1, %s608_s28  ;;  %s22_s25 = int_to_ptr.vmem [resolvable:$true] %s21_s25 }
   0x3   :  { %p612_p1 = scmp.lt.u32.totalorder %s608_s28, %s824_s1 }
   0x5   :  { %p614_p2 = pnand %p612_p1, %p609_p0 }
   0x7   :  { %617 = shalt.err (!%p614_p2)
}
   0x8   :  { %s618_s10 = scalar_lea.vmem %s22_s25, 4096  ;;  %p623_p4 = scmp.lt.s32.totalorder %s22_s25, %s22_s25 }
   0x9   :  { %p619_p3 = scmp.ne.s32.totalorder %s22_s25, %s618_s10  ;;  %p624_p5 = scmp.lt.s32.totalorder %s618_s10, %s618_s10 }
   0xb   :  { %p625_p6 = por %p624_p5, %p623_p4 }
   0xd   :  { %p626_p7 = pnand %p625_p6, %p619_p3 }
   0xf   :  { %629 = shalt.err (!%p626_p7)
}
  0x10   :  { %s657_s11 = smov 128   ;;  %s658_s12 = smov 8  }
  0x11   :  { %27 = dma.hbm_to_vmem [thread:$0]  %s824_s1, 4096, %s22_s25, [#allocation3], %s657_s11, %s657_s11, %s658_s12  }
  0x12   :  { %652 = dma.done.wait [#allocation3], 4096  }
  0x13   :  { %653 = vsyncadd [#allocation3], 4294963200  ;;  %v61_v0 = vld [vmem:[#allocation2 + $0x80] sm:$0xff]  ;;  %v62_v1 = vld [vmem:[#allocation2 + $0x88] sm:$0xff]  ;;  %vm276_vm0 = vcmask 523264  }
  0x14   :  { %v45_v2 = vld [vmem:[#allocation2] sm:$0xff]  ;;  %v516_v3 = vpack.c.bf16 %v62_v1, %v61_v0  ;;  %v46_v4 = vld [vmem:[#allocation2 + $0x8] sm:$0xff]  ;;  %v63_v5 = vld [vmem:[#allocation2 + $0x90] sm:$0xff] }
  0x15   :  { %v64_v6 = vld [vmem:[#allocation2 + $0x98] sm:$0xff]  ;;  %v518_v7 = vpack.c.bf16 %v46_v4, %v45_v2  ;;  %v47_v9 = vld [vmem:[#allocation2 + $0x10] sm:$0xff]  ;;  %v65_v11 = vld [vmem:[#allocation2 + $0xa0] sm:$0xff] }
  0x16   :  { %v520_v8 = vpack.c.bf16 %v64_v6, %v63_v5  ;;  %v48_v10 = vld [vmem:[#allocation2 + $0x18] sm:$0xff]  ;;  %517 = vmatprep.subr.bf16.mxu0 %v516_v3  ;;  %v66_v12 = vld [vmem:[#allocation2 + $0xa8] sm:$0xff]  ;;  %v49_v15 = vld [vmem:[#allocation2 + $0x20] sm:$0xff] }
  0x17   :  { %519 = vmatpush3.bf16.msra.mxu0 %v518_v7  ;;  %v522_v13 = vpack.c.bf16 %v48_v10, %v47_v9  ;;  %v524_v14 = vpack.c.bf16 %v66_v12, %v65_v11  ;;  %v50_v16 = vld [vmem:[#allocation2 + $0x28] sm:$0xff]  ;;  %v67_v17 = vld [vmem:[#allocation2 + $0xb0] sm:$0xff]  ;;  %v68_v18 = vld [vmem:[#allocation2 + $0xb8] sm:$0xff] }
  0x18   :  { %521 = vmatprep.subr.bf16.mxu0 %v520_v8  ;;  %v526_v19 = vpack.c.bf16 %v50_v16, %v49_v15  ;;  %v528_v20 = vpack.c.bf16 %v68_v18, %v67_v17  ;;  %v51_v21 = vld [vmem:[#allocation2 + $0x30] sm:$0xff]  ;;  %v52_v22 = vld [vmem:[#allocation2 + $0x38] sm:$0xff]  ;;  %v69_v23 = vld [vmem:[#allocation2 + $0xc0] sm:$0xff] }
  0x19   :  { %v70_v24 = vld [vmem:[#allocation2 + $0xc8] sm:$0xff]  ;;  %v53_v26 = vld [vmem:[#allocation2 + $0x40] sm:$0xff]  ;;  %v530_v27 = vpack.c.bf16 %v52_v22, %v51_v21  ;;  %v163_v30 = vld [vmem:[%s826_s3 + $0x10] sm:$0xff] }
  0x1a   :  { %v42_v25 = vld [vmem:[%s823_s0 + $0x8] sm:$0xff]  ;;  %v161_v28 = vld [vmem:[%s826_s3] sm:$0xff]  ;;  %v532_v31 = vpack.c.bf16 %v70_v24, %v69_v23  ;;  %v71_v33 = vld [vmem:[#allocation2 + $0xd0] sm:$0xff] }
  0x1b   :  { %523 = vmatpush3.bf16.msra.mxu0 %v522_v13  ;;  %148 = vmatprep.mubr.f32.mxu0 %v42_v25  ;;  %v162_v29 = vld [vmem:[%s826_s3 + $0x8] sm:$0xff]  ;;  %v164_v35 = vld [vmem:[%s826_s3 + $0x18] sm:$0xff]  ;;  %v165_v38 = vld [vmem:[%s826_s3 + $0x20] sm:$0xff] }
  0x1c   :  { %525 = vmatprep.subr.bf16.mxu0 %v524_v14  ;;  %v54_v32 = vld [vmem:[#allocation2 + $0x48] sm:$0xff]  ;;  %v548_v34 = vpack.c.bf16 %v162_v29, %v161_v28  ;;  %v72_v36 = vld [vmem:[#allocation2 + $0xd8] sm:$0xff]  ;;  %v552_v37 = vpack.c.bf16 %v164_v35, %v163_v30  ;;  %v55_v42 = vld [vmem:[#allocation2 + $0x50] sm:$0xff] }
  0x1d   :  { %v166_v39 = vld [vmem:[%s826_s3 + $0x28] sm:$0xff]  ;;  %v534_v40 = vpack.c.bf16 %v54_v32, %v53_v26  ;;  %v536_v41 = vpack.c.bf16 %v72_v36, %v71_v33  ;;  %v56_v43 = vld [vmem:[#allocation2 + $0x58] sm:$0xff]  ;;  %v73_v44 = vld [vmem:[#allocation2 + $0xe0] sm:$0xff] }
  0x1e   :  { %549 = vmatprep.subr.bf16.mxu1 %v548_v34  ;;  %v556_v45 = vpack.c.bf16 %v166_v39, %v165_v38  ;;  %v74_v46 = vld [vmem:[#allocation2 + $0xe8] sm:$0xff]  ;;  %v167_v47 = vld [vmem:[%s826_s3 + $0x30] sm:$0xff]  ;;  %v168_v48 = vld [vmem:[%s826_s3 + $0x38] sm:$0xff]  ;;  %v538_v49 = vpack.c.bf16 %v56_v43, %v55_v42 }
  0x1f   :  { %527 = vmatpush3.bf16.msra.mxu0 %v526_v19  ;;  %551 = vmatpush3.bf16.msra.mxu1 %v548_v34  ;;  %v540_v50 = vpack.c.bf16 %v74_v46, %v73_v44  ;;  %v57_v51 = vld [vmem:[#allocation2 + $0x60] sm:$0xff]  ;;  %v58_v52 = vld [vmem:[#allocation2 + $0x68] sm:$0xff]  ;;  %v75_v53 = vld [vmem:[#allocation2 + $0xf0] sm:$0xff]  ;;  %v560_v54 = vpack.c.bf16 %v168_v48, %v167_v47 }
  0x20   :  { %529 = vmatprep.subr.bf16.mxu0 %v528_v20  ;;  %553 = vmatprep.subr.bf16.mxu1 %v552_v37  ;;  %v76_v55 = vld [vmem:[#allocation2 + $0xf8] sm:$0xff]  ;;  %v169_v56 = vld [vmem:[%s826_s3 + $0x40] sm:$0xff]  ;;  %v170_v57 = vld [vmem:[%s826_s3 + $0x48] sm:$0xff]  ;;  %v542_v58 = vpack.c.bf16 %v58_v52, %v57_v51 }
  0x21   :  { %v544_v59 = vpack.c.bf16 %v76_v55, %v75_v53  ;;  %v59_v60 = vld [vmem:[#allocation2 + $0x70] sm:$0xff]  ;;  %v60_v61 = vld [vmem:[#allocation2 + $0x78] sm:$0xff]  ;;  %v564_v62 = vpack.c.bf16 %v170_v57, %v169_v56  ;;  %v41_v0 = vld [vmem:[%s823_s0] sm:$0xff] }
  0x22   :  { %v546_v63 = vpack.c.bf16 %v60_v61, %v59_v60  ;;  %v44_v1 = vld [vmem:[%s823_s0 + $0x18] sm:$0xff]  ;;  %v43_v2 = vld [vmem:[%s823_s0 + $0x10] sm:$0xff]  ;;  %v173_v6 = vld [vmem:[%s826_s3 + $0x60] sm:$0xff] }
  0x23   :  { %531 = vmatpush3.bf16.msra.mxu0 %v530_v27  ;;  %555 = vmatpush3.bf16.msra.mxu1 %v552_v37  ;;  %v171_v3 = vld [vmem:[%s826_s3 + $0x50] sm:$0xff]  ;;  %v172_v4 = vld [vmem:[%s826_s3 + $0x58] sm:$0xff]  ;;  %v174_v7 = vld [vmem:[%s826_s3 + $0x68] sm:$0xff] }
  0x24   :  { %533 = vmatprep.subr.bf16.mxu0 %v532_v31  ;;  %557 = vmatprep.subr.bf16.mxu1 %v556_v45  ;;  %v568_v5 = vpack.c.bf16 %v172_v4, %v171_v3  ;;  %v572_v8 = vpack.c.bf16 %v174_v7, %v173_v6  ;;  %v175_v9 = vld [vmem:[%s826_s3 + $0x70] sm:$0xff]  ;;  %v176_v10 = vld [vmem:[%s826_s3 + $0x78] sm:$0xff]  ;;  %v261_v12 = vld [vmem:[%s828_s5] sm:$0xff] }
  0x25   :  { %v576_v11 = vpack.c.bf16 %v176_v10, %v175_v9  ;;  %v262_v13 = vld [vmem:[%s828_s5 + $0x8] sm:$0xff]  ;;  %v263_v14 = vld [vmem:[%s828_s5 + $0x10] sm:$0xff]  ;;  %v264_v16 = vld [vmem:[%s828_s5 + $0x18] sm:$0xff] }
  0x26   :  { %v580_v15 = vpack.c.bf16 %v262_v13, %v261_v12  ;;  %v584_v17 = vpack.c.bf16 %v264_v16, %v263_v14  ;;  %v265_v18 = vld [vmem:[%s828_s5 + $0x20] sm:$0xff]  ;;  %v266_v19 = vld [vmem:[%s828_s5 + $0x28] sm:$0xff]  ;;  %v267_v32 = vld [vmem:[%s828_s5 + $0x30] sm:$0xff] }
  0x27   :  { %535 = vmatpush3.bf16.msra.mxu0 %v534_v40  ;;  %559 = vmatpush3.bf16.msra.mxu1 %v556_v45  ;;  %v588_v20 = vpack.c.bf16 %v266_v19, %v265_v18  ;;  %v389_v23 = vld [vmem:[%s825_s2] ss:$0 sm:$0xff]  ;;  %v268_v33 = vld [vmem:[%s828_s5 + $0x38] sm:$0xff] }
  0x28   :  { %537 = vmatprep.subr.bf16.mxu0 %v536_v41  ;;  %561 = vmatprep.subr.bf16.mxu1 %v560_v54  ;;  %v592_v34 = vpack.c.bf16 %v268_v33, %v267_v32  ;;  %v390_v35 = vld [vmem:[%s827_s4] ss:$0 sm:$0xff]  ;;  %s659_s4 = smov [#allocation5]  }
  0x29   :  { %v391_v42 = vld [vmem:[%s829_s6] ss:$0 sm:$0xff]  ;;  %s377_s5 = sshll.u32 %s659_s4, 4  ;;  %s378_s5 = int_to_ptr.vmem [resolvable:$true] %s377_s5 }
  0x2a   :  { %s630_s6 = scalar_lea.vmem %s378_s5, 256  ;;  %p635_p9 = scmp.lt.s32.totalorder %s378_s5, %s378_s5 }
  0x2b   :  { %539 = vmatpush3.bf16.msra.mxu0 %v538_v49  ;;  %563 = vmatpush3.bf16.msra.mxu1 %v560_v54  ;;  %p631_p8 = scmp.ne.s32.totalorder %s378_s5, %s630_s6  ;;  %p636_p10 = scmp.lt.s32.totalorder %s630_s6, %s630_s6 }
  0x2c   :  { %541 = vmatprep.subr.bf16.mxu0 %v540_v50  ;;  %565 = vmatprep.subr.bf16.mxu1 %v564_v62 }
  0x2d   :  { %p637_p11 = por %p636_p10, %p635_p9 }
  0x2f   :  { %543 = vmatpush3.bf16.msra.mxu0 %v542_v58  ;;  %567 = vmatpush3.bf16.msra.mxu1 %v564_v62  ;;  %p638_p12 = pnand %p637_p11, %p631_p8 }
  0x30   :  { %545 = vmatprep.subr.bf16.mxu0 %v544_v59  ;;  %569 = vmatprep.subr.bf16.mxu1 %v568_v5 }
  0x33   :  { %547 = vmatpush3.bf16.msra.mxu0 %v546_v63  ;;  %571 = vmatpush3.bf16.msra.mxu1 %v568_v5 }
  0x34   :  { %573 = vmatprep.subr.bf16.mxu1 %v572_v8  ;;  %581 = vmatprep.subr.bf16.mxu0 %v580_v15 }
  0x36   :  { %149 = vmatmul.mubr.f32.vlgmr.msra.gmra.mrb[0].mxu0 %v41_v0 }
  0x37   :  { %153 = vmatprep.mubr.f32.mxu0 %v44_v1  ;;  %575 = vmatpush3.bf16.msra.mxu1 %v572_v8 }
  0x38   :  { %577 = vmatprep.subr.bf16.mxu1 %v576_v11  ;;  %583 = vmatpush3.bf16.msra.mxu0 %v580_v15 }
  0x39   :  { %585 = vmatprep.subr.bf16.mxu0 %v584_v17 }
  0x3a   :  { %154 = vmatmul.mubr.f32.gmra.mrb[2].mxu0 %v43_v2 }
  0x3b   :  { %579 = vmatpush3.bf16.msra.mxu1 %v576_v11 }
  0x3c   :  { %587 = vmatpush3.bf16.msra.mxu0 %v584_v17 }
  0x3d   :  { %589 = vmatprep.subr.bf16.mxu0 %v588_v20 }
  0x40   :  { %591 = vmatpush3.bf16.msra.mxu0 %v588_v20 }
  0x41   :  { %593 = vmatprep.subr.bf16.mxu0 %v592_v34 }
  0x44   :  { %595 = vmatpush3.bf16.msra.mxu0 %v592_v34 }
 0x109   :  { %v428_v21 = vpop.f32.mrb[0].mxu0 }
 0x10a   :  { %v429_v22 = vpop.f32.mrb[1].mxu0 }
 0x10b   :  { %v430_v24 = vadd.f32 %v429_v22, %v428_v21 }
 0x10d   :  { %v431_v25 = vpop.f32.mrb[2].mxu0  ;;  %v151_v26 = vadd.f32 %v430_v24, %v389_v23 }
 0x10e   :  { %v432_v27 = vpop.f32.mrb[3].mxu0 }
 0x10f   :  { %v433_v28 = vadd.f32 %v432_v27, %v431_v25  ;;  %v159_v29 = vmax.f32 %v151_v26, 0.0 }
 0x111   :  { %v156_v30 = vadd.f32 %v433_v28, %v389_v23  ;;  %494 = vmatprep.mubr.f32.mxu1 %v159_v29 }
 0x113   :  { %v160_v31 = vmax.f32 %v156_v30, 0.0 }
 0x115   :  { %495 = vmatmul.mubr.f32.vlgmr.msra.gmra.mrb[0].mxu1 %v160_v31 }
 0x1e8   :  { %v496_v36 = vpop.f32.mrb[0].mxu1 }
 0x1e9   :  { %v256_v37 = vadd.f32 %v496_v36, %v390_v35  ;;  %v250_v38 = vpop.f32.mrb[1].mxu1 }
 0x1ea   :  { %v251_v39 = vadd.f32 %v390_v35, %v250_v38 }
 0x1eb   :  { %v260_v41 = vmax.f32 %v256_v37, 0.0 }
 0x1ec   :  { %v259_v40 = vmax.f32 %v251_v39, 0.0 }
 0x1ee   :  { %513 = vmatprep.mubr.msk.f32.mxu0 %vm276_vm0, %v259_v40 }
 0x1ef   :  { %514 = vmatmul.mubr.msk.f32.vlgmr.msra.gmra.mrb[4].mxu0 %vm276_vm0, %v260_v41 }
 0x2c2   :  { %v515_v43 = vpop.f32.mrb[4].mxu0 }
 0x2c3   :  { %v355_v44 = vadd.f32 %v515_v43, %v391_v42  ;;  %v349_v45 = vpop.f32.mrb[5].mxu0 }
 0x2c4   :  { %v350_v46 = vadd.f32 %v391_v42, %v349_v45 }
 0x2c5   :  { %v395_v47 = vmul.f32 -1.442695, %v355_v44 }
 0x2c6   :  { %v394_v48 = vmul.f32 -1.442695, %v350_v46 }
 0x2c7   :  { %600 = vpow2.f32 %v395_v47 }
 0x2c8   :  { %602 = vpow2.f32 %v394_v48 }
 0x2d1   :  { %v601_v49 = vpop.eup %600 }
 0x2d2   :  { %v603_v50 = vpop.eup %602  ;;  %v365_v51 = vadd.f32 1.0, %v601_v49 }
 0x2d3   :  { %v364_v52 = vadd.f32 1.0, %v603_v50 }
 0x2d4   :  { %604 = vrcp.f32 %v365_v51 }
 0x2d5   :  { %606 = vrcp.f32 %v364_v52 }
 0x2de   :  { %v605_v53 = vpop.eup %604 }
 0x2df   :  { %v607_v54 = vpop.eup %606  ;;  %371 = vst [vmem:[#allocation5 + $0x8] sm:$0xff] %v605_v53 }
 0x2e0   :  { %370 = vst [vmem:[#allocation5] sm:$0xff] %v607_v54 }
 0x2e1   :  { %641 = shalt.err (!%p638_p12)
}
 0x2e2   :  { %s642_s30 = scalar_lea.hbm %s830_s7, 256 }
 0x2e3   :  { %p643_p13 = scmp.ne.s32.totalorder %s830_s7, %s642_s30  ;;  %p646_p0 = scmp.lt.u32.totalorder %s642_s30, %s830_s7 }
 0x2e5   :  { %p648_p1 = pnand %p646_p0, %p643_p13 }
 0x2e7   :  { %651 = shalt.err (!%p648_p1)
}
 0x2e8   :  { %383 = dma.vmem_to_hbm [thread:$0]  %s378_s5, 256, %s830_s7, [#allocation4], %s657_s11, %s657_s11, %s658_s12  }
 0x2e9   :  { %654 = dma.done.wait [#allocation4], 256  }
 0x2ea   :  { %655 = vsyncadd [#allocation4], 4294967040 }
 0x2eb   :  { %387 = vsyncpa [#allocation3], 1 }
 0x2ec   :  { %388 = vsyncpa [#allocation4], 1 }

</bundles_post_ra>
